<compile_context>
chip_gen: v6e
topology: v6e:2x2x1
jax: 0.10.0
libtpu: 0.0.40
codegen_flags: <defaults>
</compile_context>

<pallas_src>
import functools

import jax
import jax.numpy as jnp
from jax.experimental import pallas as pl
from jax.experimental.pallas import tpu as pltpu


_CHUNK = 128                             # packed rows processed per inner-loop step
_VMEM_PAIR_BUDGET = 16 * 1024 * 1024     # double-buffered pred+target VMEM budget
_TILE_ROWS_CAP = 16384


def _round_up(x, m):
    return (x + m - 1) // m * m


def _packing_factor(n, c):
    """Largest g dividing n with g*c <= 128 (free contiguous reshape, no pred padding)."""
    limit = max(1, 128 // max(c, 1))
    for g in range(min(limit, n), 0, -1):
        if n % g == 0:
            return g
    return 1


def _nll_loss_kernel(tgt_ref, pred_ref, out_ref, acc_ref, *,
                     g, packed_c, n_chunks, neg_inv_n):
    i = pl.program_id(1)

    @pl.when(i == 0)
    def _init():
        acc_ref[...] = jnp.zeros_like(acc_ref)

    # (1, packed_c) lane iota: the packed class id of every lane (hoisted out of the loop).
    lane_iota = jax.lax.broadcasted_iota(jnp.int32, (1, packed_c), 1)

    def _chunk(k, carry):
        off = pl.multiple_of(k * _CHUNK, _CHUNK)
        # (g_pad, 128) lane-dense targets for this chunk -> (128, g_pad) on the idle XLU;
        # column j holds the packed class id of sub-row j (sentinel == packed_c never hits).
        tcol = jnp.transpose(tgt_ref[0, k])
        mask = tcol[:, 0:1] == lane_iota                         # (128, packed_c)
        for j in range(1, g):
            mask = mask | (tcol[:, j:j + 1] == lane_iota)
        pred_chunk = pred_ref[pl.ds(off, _CHUNK), :]             # native dtype tile slice
        acc_ref[...] += jnp.where(mask, pred_chunk, 0).astype(jnp.float32)
        return carry

    jax.lax.fori_loop(0, n_chunks, _chunk, 0)

    @pl.when(i == pl.num_programs(1) - 1)
    def _finalize():
        col = jnp.sum(acc_ref[...], axis=0, keepdims=True)       # (1, packed_c)
        total = jnp.sum(col, axis=1, keepdims=True)              # (1, 1)
        out_ref[0] = total * neg_inv_n                           # per-core partial of -sum/N


def get_loss(pred, target, trans_feat=None, *, tile_rows=None):
    """JAX/Pallas equivalent of the PyTorch get_loss.forward (mean F.nll_loss)."""
    del trans_feat  # unused by the reference module's forward
    n, c = pred.shape
    itemsize = jnp.dtype(pred.dtype).itemsize

    # ---- lane packing: pred (N, C) -> (N/g, g*C), free contiguous reshape ----
    g = _packing_factor(n, c)
    n_packed = n // g
    packed_c = g * c
    g_pad = _round_up(g, 8)                       # stored target sub-rows (sublane pad)
    pred_packed = pred.reshape(n_packed, packed_c)

    # ---- tile sizing off *padded* VMEM bytes (double-buffered pred + targets) ----
    lanes = _round_up(packed_c, 128)
    row_bytes = lanes * itemsize + 4 * g_pad      # per packed row, lane-padded VMEM
    if tile_rows is None:
        tile_rows = _VMEM_PAIR_BUDGET // (2 * row_bytes)
    tile_rows = max(_CHUNK, min(tile_rows, _TILE_ROWS_CAP, _round_up(n_packed, _CHUNK)))
    tile_rows = (tile_rows // _CHUNK) * _CHUNK
    n_chunks = tile_rows // _CHUNK

    t_pred = pl.cdiv(n_packed, tile_rows)         # row tiles holding real data
    num_outer = 2 if t_pred >= 2 else 1           # v7x: one partial per TensorCore
    tpc = pl.cdiv(t_pred, num_outer)              # row tiles per core
    covered_tiles = num_outer * tpc
    covered_rows = covered_tiles * tile_rows

    # ---- lane-dense, sentinel-padded targets: (tiles, n_chunks, g_pad, 128) int32 ----
    sentinel = packed_c                           # never matches any class lane
    tgt = target.astype(jnp.int32).reshape(n_packed, g)
    tgt = tgt + (jnp.arange(g, dtype=jnp.int32) * c)[None, :]
    tgt = jnp.pad(tgt, ((0, covered_rows - n_packed), (0, g_pad - g)),
                  constant_values=sentinel)
    tgt = tgt.reshape(covered_tiles, n_chunks, _CHUNK, g_pad).transpose(0, 1, 3, 2)

    kernel = functools.partial(_nll_loss_kernel, g=g, packed_c=packed_c,
                               n_chunks=n_chunks, neg_inv_n=-1.0 / n)

    out = pl.pallas_call(
        kernel,
        out_shape=jax.ShapeDtypeStruct((num_outer, 1, 1), jnp.float32),
        grid_spec=pltpu.PrefetchScalarGridSpec(
            num_scalar_prefetch=0,
            grid=(num_outer, tpc),
            in_specs=[
                pl.BlockSpec((1, n_chunks, g_pad, _CHUNK),
                             lambda p, i: (p * tpc + i, 0, 0, 0)),
                # Clamp: overhang tiles (odd t_pred) re-read the last real tile; their
                # targets are all-sentinel so they contribute nothing to the sum.
                pl.BlockSpec((tile_rows, packed_c),
                             lambda p, i: (jnp.minimum(p * tpc + i, t_pred - 1), 0)),
            ],
            out_specs=pl.BlockSpec((1, 1, 1), lambda p, i: (p, 0, 0)),
            scratch_shapes=[pltpu.VMEM((_CHUNK, packed_c), jnp.float32)],
        ),
        compiler_params=pltpu.CompilerParams(
            dimension_semantics=("parallel", "arbitrary"),
            vmem_limit_bytes=32 * 1024 * 1024,
        ),
        cost_estimate=pl.CostEstimate(
            flops=2 * n * c,
            transcendentals=0,
            bytes_accessed=n * c * itemsize + n * 4 + num_outer * 4,
        ),
    )(tgt, pred_packed)
    # Each core partial is already scaled by -1/N; summing the partials gives the mean NLL.
    return jnp.sum(out)


def _ref_loss(pred, target):
    p = pred.astype(jnp.float32)
    return -jnp.mean(p[jnp.arange(p.shape[0]), target])


if __name__ == "__main__":
    key = jax.random.PRNGKey(0)

    # Case 1: PointNet++-like head, f32, lane packing g=3 (N=24, C=40).
    k1, k2, k3 = jax.random.split(key, 3)
    n1, c1 = 24, 40
    pred1 = jax.nn.log_softmax(jax.random.normal(k1, (n1, c1), jnp.float32), axis=-1)
    tgt1 = jax.random.randint(k2, (n1,), 0, c1, dtype=jnp.int32)
    trans_feat = jax.random.normal(k3, (n1, 3, 3), jnp.float32)   # unused, like the module
    loss1 = get_loss(pred1, tgt1, trans_feat)
    jax.block_until_ready(loss1)
    assert jnp.allclose(loss1, _ref_loss(pred1, tgt1), atol=1e-5, rtol=1e-5), (loss1,)

    # Case 2: prime N -> no lane packing (g=1), partial tile handled via sentinel targets.
    pred2 = jax.nn.log_softmax(
        jax.random.normal(jax.random.PRNGKey(1), (7, 40), jnp.float32), axis=-1)
    tgt2 = jax.random.randint(jax.random.PRNGKey(2), (7,), 0, 40, dtype=jnp.int32)
    loss2 = get_loss(pred2, tgt2, None)
    jax.block_until_ready(loss2)
    assert jnp.allclose(loss2, _ref_loss(pred2, tgt2), atol=1e-5, rtol=1e-5), (loss2,)

    # Case 3: bf16 pred DMA'd in native dtype, f32 accumulation (g=2, C=40).
    pred3 = jax.nn.log_softmax(
        jax.random.normal(jax.random.PRNGKey(3), (64, 40), jnp.float32), axis=-1)
    pred3 = pred3.astype(jnp.bfloat16)
    tgt3 = jax.random.randint(jax.random.PRNGKey(4), (64,), 0, 40, dtype=jnp.int32)
    loss3 = get_loss(pred3, tgt3, None)
    jax.block_until_ready(loss3)
    assert jnp.allclose(loss3, _ref_loss(pred3, tgt3), atol=1e-5, rtol=1e-5), (loss3,)

    # Case 4: multi-tile grid, 2-way core split, odd tile count (clamped overhang tile).
    n4, c4 = 2400, 16      # g=8 -> 300 packed rows -> 3 row tiles at tile_rows=128
    pred4 = jax.nn.log_softmax(
        jax.random.normal(jax.random.PRNGKey(5), (n4, c4), jnp.float32), axis=-1)
    tgt4 = jax.random.randint(jax.random.PRNGKey(6), (n4,), 0, c4, dtype=jnp.int32)
    loss4 = get_loss(pred4, tgt4, None, tile_rows=128)
    jax.block_until_ready(loss4)
    assert jnp.allclose(loss4, _ref_loss(pred4, tgt4), atol=1e-5, rtol=1e-5), (loss4,)

    print("KERNEL_OK")
</pallas_src>

<mosaic_0001>
module attributes {stable_mosaic.version = 11 : i64} {
  func.func @_nll_loss_kernel(%arg0: i32, %arg1: i32, %arg2: memref<1x1x8x128xi32, #tpu.memory_space<vmem>>, %arg3: memref<128x120xf32, #tpu.memory_space<vmem>>, %arg4: memref<1x1x1xf32, #tpu.memory_space<vmem>>, %arg5: memref<128x120xf32, #tpu.memory_space<vmem>>) attributes {dimension_semantics = [#tpu.dimension_semantics<parallel>, #tpu.dimension_semantics<arbitrary>], iteration_bounds = array<i64: 1, 1>, scalar_prefetch = 0 : i64, scratch_operands = 1 : i64, tpu.core_type = #tpu.core_type<tc>, window_params = [{transform_indices = @transform_0, window_bounds = array<i64: 1, 1, 8, 128>}, {transform_indices = @transform_1, window_bounds = array<i64: 128, 120>}, {transform_indices = @transform_2, window_bounds = array<i64: 1, 1, 1>}]} {
    %c0_i32 = arith.constant 0 : i32
    %0 = arith.cmpi eq, %arg1, %c0_i32 : i32
    %1 = arith.extui %0 : i1 to i32
    %c0_i32_0 = arith.constant 0 : i32
    %2 = arith.cmpi ne, %1, %c0_i32_0 : i32
    scf.if %2 {
      %cst = arith.constant 0.000000e+00 : f32
      %35 = vector.broadcast %cst : f32 to vector<128x120xf32>
      %c0_12 = arith.constant 0 : index
      %c0_13 = arith.constant 0 : index
      %36 = vector.load %arg5[%c0_12, %c0_13] : memref<128x120xf32, #tpu.memory_space<vmem>>, vector<128x120xf32>
      tpu.vector_store %arg5[%c0_12, %c0_13], %35 {strides = array<i32>} : memref<128x120xf32, #tpu.memory_space<vmem>>, vector<128x120xf32>,
    } else {
    }
    %3 = tpu.iota {dimensions = array<i32: 1>} : vector<1x120xi32>
    %c0_i32_1 = arith.constant 0 : i32
    %c128_i32 = arith.constant 128 : i32
    %4 = arith.muli %c0_i32_1, %c128_i32 : i32
    %5 = tpu.assume_multiple %4, 128 : i32
    %c0 = arith.constant 0 : index
    %6 = arith.index_cast %c0_i32_1 : i32 to index
    %c0_2 = arith.constant 0 : index
    %c0_3 = arith.constant 0 : index
    %7 = vector.load %arg2[%c0, %6, %c0_2, %c0_3] : memref<1x1x8x128xi32, #tpu.memory_space<vmem>>, vector<1x1x8x128xi32>
    %8 = vector.shape_cast %7 : vector<1x1x8x128xi32> to vector<8x128xi32>
    %9 = tpu.transpose %8, [1, 0] : vector<8x128xi32> -> vector<128x8xi32>
    %10 = vector.extract_strided_slice %9 {offsets = [0, 0], sizes = [128, 1], strides = [1, 1]} : vector<128x8xi32> to vector<128x1xi32>
    %11 = vector.broadcast %10 : vector<128x1xi32> to vector<128x120xi32>
    %12 = vector.broadcast %3 : vector<1x120xi32> to vector<128x120xi32>
    %13 = arith.cmpi eq, %11, %12 : vector<128x120xi32>
    %14 = vector.extract_strided_slice %9 {offsets = [0, 1], sizes = [128, 1], strides = [1, 1]} : vector<128x8xi32> to vector<128x1xi32>
    %15 = vector.broadcast %14 : vector<128x1xi32> to vector<128x120xi32>
    %16 = vector.broadcast %3 : vector<1x120xi32> to vector<128x120xi32>
    %17 = arith.cmpi eq, %15, %16 : vector<128x120xi32>
    %18 = arith.ori %13, %17 : vector<128x120xi1>
    %19 = vector.extract_strided_slice %9 {offsets = [0, 2], sizes = [128, 1], strides = [1, 1]} : vector<128x8xi32> to vector<128x1xi32>
    %20 = vector.broadcast %19 : vector<128x1xi32> to vector<128x120xi32>
    %21 = vector.broadcast %3 : vector<1x120xi32> to vector<128x120xi32>
    %22 = arith.cmpi eq, %20, %21 : vector<128x120xi32>
    %23 = arith.ori %18, %22 : vector<128x120xi1>
    %24 = arith.index_cast %5 : i32 to index
    %c0_4 = arith.constant 0 : index
    %25 = vector.load %arg3[%24, %c0_4] : memref<128x120xf32, #tpu.memory_space<vmem>>, vector<128x120xf32>
    %c0_5 = arith.constant 0 : index
    %c0_6 = arith.constant 0 : index
    %26 = vector.load %arg5[%c0_5, %c0_6] : memref<128x120xf32, #tpu.memory_space<vmem>>, vector<128x120xf32>
    %c0_i32_7 = arith.constant 0 : i32
    %27 = arith.sitofp %c0_i32_7 : i32 to f32
    %28 = vector.broadcast %27 : f32 to vector<128x120xf32>
    %29 = arith.select %23, %25, %28 : vector<128x120xi1>, vector<128x120xf32>
    %30 = arith.addf %26, %29 : vector<128x120xf32>
    %c0_8 = arith.constant 0 : index
    %c0_9 = arith.constant 0 : index
    %31 = vector.load %arg5[%c0_8, %c0_9] : memref<128x120xf32, #tpu.memory_space<vmem>>, vector<128x120xf32>
    tpu.vector_store %arg5[%c0_8, %c0_9], %30 {strides = array<i32>} : memref<128x120xf32, #tpu.memory_space<vmem>>, vector<128x120xf32>,
    %c1_i32 = arith.constant 1 : i32
    %c0_i32_10 = arith.constant 0 : i32
    %32 = arith.cmpi eq, %arg1, %c0_i32_10 : i32
    %33 = arith.extui %32 : i1 to i32
    %c0_i32_11 = arith.constant 0 : i32
    %34 = arith.cmpi ne, %33, %c0_i32_11 : i32
    scf.if %34 {
      %c0_12 = arith.constant 0 : index
      %c0_13 = arith.constant 0 : index
      %35 = vector.load %arg5[%c0_12, %c0_13] : memref<128x120xf32, #tpu.memory_space<vmem>>, vector<128x120xf32>
      %cst = arith.constant dense<0.000000e+00> : vector<120xf32>
      %36 = vector.multi_reduction <add>, %35, %cst [0] : vector<128x120xf32> to vector<120xf32>
      %37 = vector.shape_cast %36 : vector<120xf32> to vector<1x120xf32>
      %cst_14 = arith.constant dense<0.000000e+00> : vector<1xf32>
      %38 = vector.multi_reduction <add>, %37, %cst_14 [1] : vector<1x120xf32> to vector<1xf32>
      %39 = vector.shape_cast %38 : vector<1xf32> to vector<1x1xf32>
      %cst_15 = arith.constant -0.0416666679 : f32
      %40 = vector.broadcast %cst_15 : f32 to vector<1x1xf32>
      %41 = arith.mulf %39, %40 : vector<1x1xf32>
      %c0_16 = arith.constant 0 : index
      %c0_17 = arith.constant 0 : index
      %c0_18 = arith.constant 0 : index
      %42 = vector.load %arg4[%c0_16, %c0_17, %c0_18] : memref<1x1x1xf32, #tpu.memory_space<vmem>>, vector<1x1x1xf32>
      %43 = vector.shape_cast %42 : vector<1x1x1xf32> to vector<1x1xf32>
      %44 = vector.shape_cast %41 : vector<1x1xf32> to vector<1x1x1xf32>
      tpu.vector_store %arg4[%c0_16, %c0_17, %c0_18], %44 {strides = array<i32>} : memref<1x1x1xf32, #tpu.memory_space<vmem>>, vector<1x1x1xf32>,
    } else {
    }
    return
  }
  func.func @transform_0(%arg0: i32, %arg1: i32) -> (i32, i32, i32, i32) {
    %c1_i32 = arith.constant 1 : i32
    %0 = arith.muli %arg0, %c1_i32 : i32
    %1 = arith.addi %0, %arg1 : i32
    %c0_i32 = arith.constant 0 : i32
    %c0_i32_0 = arith.constant 0 : i32
    %c0_i32_1 = arith.constant 0 : i32
    %c0_i32_2 = arith.constant 0 : i32
    return %1, %c0_i32, %c0_i32_0, %c0_i32_1 : i32, i32, i32, i32
  }
  func.func @transform_1(%arg0: i32, %arg1: i32) -> (i32, i32) {
    %c1_i32 = arith.constant 1 : i32
    %0 = arith.muli %arg0, %c1_i32 : i32
    %1 = arith.addi %0, %arg1 : i32
    %c0_i32 = arith.constant 0 : i32
    %2 = arith.minsi %1, %c0_i32 : i32
    %c0_i32_0 = arith.constant 0 : i32
    %c0_i32_1 = arith.constant 0 : i32
    return %2, %c0_i32_0 : i32, i32
  }
  func.func @transform_2(%arg0: i32, %arg1: i32) -> (i32, i32, i32) {
    %c0_i32 = arith.constant 0 : i32
    %c0_i32_0 = arith.constant 0 : i32
    %c0_i32_1 = arith.constant 0 : i32
    return %arg0, %c0_i32, %c0_i32_0 : i32, i32, i32
  }
}

</mosaic_0001>

<bundles_post_ra>
// kernel: tpu_custom_call.1
= control target key start
LH: loop header
LB: loop body
LE: loop exit
PB: predicated region body
PF: predicated region fallthrough
CT: control target
= control target key end

     0   :  { %7 = vsyncpa [#allocation4], 0  ;;  %s831_s0 = inlined_call_operand.hbm [shape: s32[1,1,8,128], index: 0, kind: input, shape index: {}]   ;;  %s832_s1 = inlined_call_operand.hbm [shape: f32[8,120], index: 1, kind: input, shape index: {}]   ;;  %s833_s2 = inlined_call_operand.hbm [shape: f32[1,1,1], index: 2, kind: output, shape index: {}]  }
   0x1   :  { %8 = vsyncpa [#allocation7], 0 }
   0x2   :  { %9 = vsyncpa [#allocation5], 0  ;;  %s619_s9 = smov [#allocation3]  }
   0x3   :  { %s19_s10 = sshll.u32 %s619_s9, 4  ;;  %s20_s10 = int_to_ptr.vmem [resolvable:$true] %s19_s10 }
   0x4   :  { %s561_s11 = scalar_lea.vmem %s20_s10, 128  ;;  %p566_p1 = scmp.lt.s32.totalorder %s20_s10, %s20_s10 }
   0x5   :  { %p562_p0 = scmp.ne.s32.totalorder %s20_s10, %s561_s11  ;;  %p567_p2 = scmp.lt.s32.totalorder %s561_s11, %s561_s11 }
   0x7   :  { %p568_p3 = por %p567_p2, %p566_p1 }
   0x9   :  { %p569_p4 = pnand %p568_p3, %p562_p0 }
   0xb   :  { %572 = shalt.err (!%p569_p4)
}
   0xc   :  { %22 = dma.hbm_to_vmem [thread:$0]  %s831_s0, 128, %s20_s10, [#allocation4]  }
   0xd   :  { %33 = vsyncadd [#allocation7], 1920  ;;  %s620_s14 = smov [#allocation6]  }
   0xe   :  { %s38_s15 = sshll.u32 %s620_s14, 4  ;;  %s39_s15 = int_to_ptr.vmem [resolvable:$true] %s38_s15 }
   0xf   :  { %s581_s16 = scalar_lea.vmem %s39_s15, 128  ;;  %s585_s17 = scalar_lea.vmem %s39_s15, 2048 }
  0x10   :  { %p582_p5 = scmp.ne.s32.totalorder %s39_s15, %s581_s16  ;;  %p586_p6 = scmp.lt.s32.totalorder %s39_s15, %s39_s15 }
  0x11   :  { %p587_p7 = scmp.lt.s32.totalorder %s585_s17, %s581_s16 }
  0x13   :  { %p588_p8 = por %p587_p7, %p586_p6 }
  0x15   :  { %p589_p9 = pnand %p588_p8, %p582_p5 }
  0x17   :  { %592 = shalt.err (!%p589_p9)
}
  0x18   :  { %s621_s18 = smov 128   ;;  %s622_s19 = smov 8  }
  0x19   :  { %44 = dma.hbm_to_vmem [thread:$0]  %s832_s1, 128, %s39_s15, [#allocation7], %s621_s18, %s621_s18, %s622_s19  }
  0x1a   :  { %613 = dma.done.wait [#allocation4], 128  }
  0x1b   :  { %614 = vsyncadd [#allocation4], 4294967168 }
  0x1c   :  { %615 = dma.done.wait [#allocation7], 2048  }
  0x1d   :  { %616 = vsyncadd [#allocation7], 4294965248  ;;  %v623_v0 = vmov 1   ;;  %v81_v1 = vld [vmem:[#allocation3] sm:$0xff]  ;;  %v624_v2 = vmov 0   ;;  %vm62_vm0 = vcmask 982016   ;;  %v79_v21 = vlaneseq }
  0x1e   :  { %509 = vset.pattern.permute.xlu1 %v623_v0  ;;  %82 = vxpose.xlu0.b32.start.end [1/1] (short) %v81_v1, 128  ;;  %v625_v3 = vmov 0.0   ;;  %v626_v6 = vmov 2   ;;  %v338_v25 = vld [vmem:[#allocation6] sm:$0xff]  ;;  %v339_v32 = vld [vmem:[#allocation6 + $0x8] sm:$0xff]  ;;  %v340_v39 = vld [vmem:[#allocation6 + $0x10] sm:$0xff]  ;;  %s627_s0 = smov [#allocation8]  }
  0x1f   :  { %63 = vst.msk [vmem:[#allocation2] sm:$0xff] %vm62_vm0, %v625_v3  ;;  %64 = vst.msk [vmem:[#allocation2 + $0x8] sm:$0xff] %vm62_vm0, %v625_v3  ;;  %v718_v22 = vand.u32 127, %v79_v21  ;;  %v341_v46 = vld [vmem:[#allocation6 + $0x18] sm:$0xff]  ;;  %v342_v53 = vld [vmem:[#allocation6 + $0x20] sm:$0xff]  ;;  %s487_s1 = sshll.u32 %s627_s0, 4  ;;  %s488_s1 = int_to_ptr.vmem [resolvable:$true] %s487_s1 }
  0x20   :  { %65 = vst.msk [vmem:[#allocation2 + $0x10] sm:$0xff] %vm62_vm0, %v625_v3  ;;  %66 = vst.msk [vmem:[#allocation2 + $0x18] sm:$0xff] %vm62_vm0, %v625_v3  ;;  %v343_v60 = vld [vmem:[#allocation6 + $0x28] sm:$0xff]  ;;  %s593_s22 = scalar_lea.vmem %s488_s1, 16  ;;  %s597_s23 = scalar_lea.vmem %s488_s1, 32 }
  0x21   :  { %67 = vst.msk [vmem:[#allocation2 + $0x20] sm:$0xff] %vm62_vm0, %v625_v3  ;;  %68 = vst.msk [vmem:[#allocation2 + $0x28] sm:$0xff] %vm62_vm0, %v625_v3  ;;  %p594_p10 = scmp.ne.s32.totalorder %s488_s1, %s593_s22  ;;  %p598_p11 = scmp.lt.s32.totalorder %s488_s1, %s488_s1 }
  0x22   :  { %69 = vst.msk [vmem:[#allocation2 + $0x30] sm:$0xff] %vm62_vm0, %v625_v3  ;;  %70 = vst.msk [vmem:[#allocation2 + $0x38] sm:$0xff] %vm62_vm0, %v625_v3  ;;  %p599_p12 = scmp.lt.s32.totalorder %s597_s23, %s593_s22 }
  0x23   :  { %71 = vst.msk [vmem:[#allocation2 + $0x40] sm:$0xff] %vm62_vm0, %v625_v3  ;;  %72 = vst.msk [vmem:[#allocation2 + $0x48] sm:$0xff] %vm62_vm0, %v625_v3 }
  0x24   :  { %73 = vst.msk [vmem:[#allocation2 + $0x50] sm:$0xff] %vm62_vm0, %v625_v3  ;;  %74 = vst.msk [vmem:[#allocation2 + $0x58] sm:$0xff] %vm62_vm0, %v625_v3  ;;  %p600_p13 = por %p599_p12, %p598_p11 }
  0x25   :  { %75 = vst.msk [vmem:[#allocation2 + $0x60] sm:$0xff] %vm62_vm0, %v625_v3  ;;  %76 = vst.msk [vmem:[#allocation2 + $0x68] sm:$0xff] %vm62_vm0, %v625_v3 }
  0x26   :  { %77 = vst.msk [vmem:[#allocation2 + $0x70] sm:$0xff] %vm62_vm0, %v625_v3  ;;  %78 = vst.msk [vmem:[#allocation2 + $0x78] sm:$0xff] %vm62_vm0, %v625_v3  ;;  %v354_v27 = vld [vmem:[#allocation2] sm:$0xff]  ;;  %v355_v34 = vld [vmem:[#allocation2 + $0x8] sm:$0xff]  ;;  %p601_p0 = pnand %p600_p13, %p594_p10 }
  0x27   :  { %v356_v41 = vld [vmem:[#allocation2 + $0x10] sm:$0xff]  ;;  %v357_v48 = vld [vmem:[#allocation2 + $0x18] sm:$0xff] }
  0x28   :  { %v358_v55 = vld [vmem:[#allocation2 + $0x20] sm:$0xff]  ;;  %v359_v62 = vld [vmem:[#allocation2 + $0x28] sm:$0xff]  ;;  %v344_v3 = vld [vmem:[#allocation6 + $0x30] sm:$0xff] }
  0x47   :  { %508 = vset.pattern.permute.xlu0 %v624_v2 }
  0x9a   :  { %v98_v4 = vpop.trf.xlu0 }
  0x9b   :  { %179 = vperm.xlu1 %509, %v98_v4   ;;  %115 = vperm.xlu0 %508, %v98_v4  }
  0x9e   :  { %v99_v5 = vpop.trf.xlu0 }
  0x9f   :  { %510 = vset.pattern.permute.xlu1 %v626_v6  ;;  %536 = vset.pattern.permute.xlu0 %v623_v0 }
  0xa0   :  { %259 = vperm.xlu1 %510, %v98_v4  }
  0xa2   :  { %v100_v7 = vpop.trf.xlu0 }
  0xa4   :  { %511 = vset.pattern.permute.xlu1 %v624_v2 }
  0xa5   :  { %118 = vperm.xlu1 %511, %v99_v5  }
  0xa6   :  { %v101_v8 = vpop.trf.xlu0 }
  0xa9   :  { %512 = vset.pattern.permute.xlu1 %v623_v0 }
  0xaa   :  { %182 = vperm.xlu1 %512, %v99_v5   ;;  %v102_v9 = vpop.trf.xlu0 }
  0xae   :  { %513 = vset.pattern.permute.xlu1 %v626_v6  ;;  %v103_v10 = vpop.trf.xlu0 }
  0xaf   :  { %262 = vperm.xlu1 %513, %v99_v5   ;;  %v360_v5 = vld [vmem:[#allocation2 + $0x30] sm:$0xff] }
  0xb2   :  { %v104_v11 = vpop.trf.xlu0 }
  0xb3   :  { %514 = vset.pattern.permute.xlu1 %v624_v2 }
  0xb4   :  { %121 = vperm.xlu1 %514, %v100_v7  }
  0xb6   :  { %v105_v12 = vpop.trf.xlu0 }
  0xb8   :  { %515 = vset.pattern.permute.xlu1 %v623_v0 }
  0xb9   :  { %185 = vperm.xlu1 %515, %v100_v7  }
  0xba   :  { %v106_v13 = vpop.trf.xlu0 }
  0xbd   :  { %516 = vset.pattern.permute.xlu1 %v626_v6 }
  0xbe   :  { %265 = vperm.xlu1 %516, %v100_v7   ;;  %v675_v14 = vpop.trf.xlu0 }
  0xbf   :  { %206 = vperm.xlu0 %536, %v675_v14  }
  0xc2   :  { %517 = vset.pattern.permute.xlu1 %v624_v2  ;;  %v679_v15 = vpop.trf.xlu0 }
  0xc3   :  { %124 = vperm.xlu1 %517, %v101_v8   ;;  %209 = vperm.xlu0 %536, %v679_v15  }
  0xc6   :  { %v682_v16 = vpop.trf.xlu0 }
  0xc7   :  { %518 = vset.pattern.permute.xlu1 %v623_v0  ;;  %540 = vset.pattern.permute.xlu0 %v624_v2 }
  0xc8   :  { %188 = vperm.xlu1 %518, %v101_v8   ;;  %148 = vperm.xlu0 %540, %v682_v16  }
  0xca   :  { %v687_v17 = vpop.trf.xlu0 }
  0xcc   :  { %519 = vset.pattern.permute.xlu1 %v626_v6  ;;  %151 = vperm.xlu0 %540, %v687_v17  }
  0xcd   :  { %268 = vperm.xlu1 %519, %v101_v8  }
  0xce   :  { %v693_v18 = vpop.trf.xlu0 }
  0xd0   :  { %544 = vset.pattern.permute.xlu0 %v626_v6 }
  0xd1   :  { %520 = vset.pattern.permute.xlu1 %v624_v2  ;;  %295 = vperm.xlu0 %544, %v687_v17  }
  0xd2   :  { %127 = vperm.xlu1 %520, %v102_v9   ;;  %v698_v19 = vpop.trf.xlu0 }
  0xd5   :  { %298 = vperm.xlu0 %544, %v693_v18  }
  0xd6   :  { %521 = vset.pattern.permute.xlu1 %v623_v0  ;;  %v703_v20 = vpop.trf.xlu0 }
  0xd7   :  { %191 = vperm.xlu1 %521, %v102_v9  }
  0xd9   :  { %548 = vset.pattern.permute.xlu0 %v623_v0 }
  0xda   :  { %221 = vperm.xlu0 %548, %v698_v19  }
  0xdb   :  { %522 = vset.pattern.permute.xlu1 %v626_v6 }
  0xdc   :  { %271 = vperm.xlu1 %522, %v102_v9  }
  0xde   :  { %224 = vperm.xlu0 %548, %v703_v20  }
  0xe0   :  { %523 = vset.pattern.permute.xlu1 %v624_v2 }
  0xe1   :  { %130 = vperm.xlu1 %523, %v103_v10  }
  0xe2   :  { %552 = vset.pattern.permute.xlu0 %v626_v6 }
  0xe5   :  { %524 = vset.pattern.permute.xlu1 %v623_v0 }
  0xe6   :  { %194 = vperm.xlu1 %524, %v103_v10  }
  0xea   :  { %525 = vset.pattern.permute.xlu1 %v626_v6 }
  0xeb   :  { %274 = vperm.xlu1 %525, %v103_v10   ;;  %v345_v10 = vld [vmem:[#allocation6 + $0x38] sm:$0xff] }
  0xef   :  { %526 = vset.pattern.permute.xlu1 %v624_v2 }
  0xf0   :  { %133 = vperm.xlu1 %526, %v104_v11  }
  0xf4   :  { %527 = vset.pattern.permute.xlu1 %v623_v0 }
  0xf5   :  { %197 = vperm.xlu1 %527, %v104_v11  }
  0xf9   :  { %528 = vset.pattern.permute.xlu1 %v626_v6 }
  0xfa   :  { %277 = vperm.xlu1 %528, %v104_v11  }
  0xfe   :  { %529 = vset.pattern.permute.xlu1 %v624_v2 }
  0xff   :  { %136 = vperm.xlu1 %529, %v105_v12  }
 0x103   :  { %530 = vset.pattern.permute.xlu1 %v623_v0 }
 0x104   :  { %200 = vperm.xlu1 %530, %v105_v12  }
 0x108   :  { %531 = vset.pattern.permute.xlu1 %v626_v6 }
 0x109   :  { %280 = vperm.xlu1 %531, %v105_v12   ;;  %v361_v12 = vld [vmem:[#allocation2 + $0x38] sm:$0xff] }
 0x10d   :  { %532 = vset.pattern.permute.xlu1 %v624_v2 }
 0x10e   :  { %139 = vperm.xlu1 %532, %v106_v13  }
 0x112   :  { %533 = vset.pattern.permute.xlu1 %v623_v0 }
 0x113   :  { %203 = vperm.xlu1 %533, %v106_v13  }
 0x116   :  { %v180_v23 = vpop.permute.xlu1 %179  ;;  %v116_v24 = vpop.permute.xlu0 %115 }
 0x117   :  { %534 = vset.pattern.permute.xlu1 %v626_v6  ;;  %vm226_vm1 = vcmp.eq.s32.totalorder %v180_v23, %v718_v22  ;;  %vm162_vm2 = vcmp.eq.s32.totalorder %v116_v24, %v718_v22 }
 0x118   :  { %283 = vperm.xlu1 %534, %v106_v13   ;;  %vm242_vm3 = vmor %vm162_vm2, %vm226_vm1 }
 0x11b   :  { %v260_v26 = vpop.permute.xlu1 %259 }
 0x11c   :  { %vm306_vm4 = vcmp.eq.s32.totalorder %v260_v26, %v718_v22  ;;  %535 = vset.pattern.permute.xlu1 %v624_v2 }
 0x11d   :  { %vm322_vm5 = vmor %vm242_vm3, %vm306_vm4  ;;  %142 = vperm.xlu1 %535, %v675_v14  }
 0x11e   :  { %v370_v28 = vsel %vm322_vm5, %v338_v25, 0.0  ;;  %v347_v25 = vld [vmem:[#allocation6 + $0x48] sm:$0xff] }
 0x11f   :  { %v386_v29 = vadd.f32 %v370_v28, %v354_v27  ;;  %v363_v27 = vld [vmem:[#allocation2 + $0x48] sm:$0xff] }
 0x120   :  { %v119_v30 = vpop.permute.xlu1 %118 }
 0x121   :  { %403 = vst.msk [vmem:[#allocation2] sm:$0xff] %vm62_vm0, %v386_v29  ;;  %537 = vset.pattern.permute.xlu1 %v626_v6  ;;  %vm163_vm7 = vcmp.eq.s32.totalorder %v119_v30, %v718_v22 }
 0x122   :  { %286 = vperm.xlu1 %537, %v675_v14  }
 0x125   :  { %v183_v31 = vpop.permute.xlu1 %182 }
 0x126   :  { %538 = vset.pattern.permute.xlu1 %v624_v2  ;;  %vm227_vm6 = vcmp.eq.s32.totalorder %v183_v31, %v718_v22 }
 0x127   :  { %145 = vperm.xlu1 %538, %v679_v15   ;;  %vm243_vm8 = vmor %vm163_vm7, %vm227_vm6 }
 0x12a   :  { %v263_v33 = vpop.permute.xlu1 %262 }
 0x12b   :  { %vm307_vm9 = vcmp.eq.s32.totalorder %v263_v33, %v718_v22  ;;  %539 = vset.pattern.permute.xlu1 %v626_v6 }
 0x12c   :  { %vm323_vm10 = vmor %vm243_vm8, %vm307_vm9  ;;  %289 = vperm.xlu1 %539, %v679_v15  }
 0x12d   :  { %v371_v35 = vsel %vm323_vm10, %v339_v32, 0.0  ;;  %v348_v32 = vld [vmem:[#allocation6 + $0x50] sm:$0xff] }
 0x12e   :  { %v387_v36 = vadd.f32 %v371_v35, %v355_v34  ;;  %v364_v34 = vld [vmem:[#allocation2 + $0x50] sm:$0xff] }
 0x12f   :  { %v122_v37 = vpop.permute.xlu1 %121 }
 0x130   :  { %404 = vst.msk [vmem:[#allocation2 + $0x8] sm:$0xff] %vm62_vm0, %v387_v36  ;;  %541 = vset.pattern.permute.xlu1 %v623_v0  ;;  %vm164_vm12 = vcmp.eq.s32.totalorder %v122_v37, %v718_v22 }
 0x131   :  { %212 = vperm.xlu1 %541, %v682_v16  }
 0x134   :  { %v186_v38 = vpop.permute.xlu1 %185 }
 0x135   :  { %542 = vset.pattern.permute.xlu1 %v626_v6  ;;  %vm228_vm11 = vcmp.eq.s32.totalorder %v186_v38, %v718_v22 }
 0x136   :  { %292 = vperm.xlu1 %542, %v682_v16   ;;  %vm244_vm13 = vmor %vm164_vm12, %vm228_vm11 }
 0x139   :  { %v266_v40 = vpop.permute.xlu1 %265 }
 0x13a   :  { %vm308_vm14 = vcmp.eq.s32.totalorder %v266_v40, %v718_v22  ;;  %543 = vset.pattern.permute.xlu1 %v623_v0  ;;  %v207_v24 = vpop.permute.xlu0 %206  ;;  %v349_v40 = vld [vmem:[#allocation6 + $0x58] sm:$0xff] }
 0x13b   :  { %vm324_vm15 = vmor %vm244_vm13, %vm308_vm14  ;;  %215 = vperm.xlu1 %543, %v687_v17   ;;  %v346_v17 = vld [vmem:[#allocation6 + $0x40] sm:$0xff] }
 0x13c   :  { %v372_v42 = vsel %vm324_vm15, %v340_v39, 0.0 }
 0x13d   :  { %v388_v43 = vadd.f32 %v372_v42, %v356_v41  ;;  %v365_v42 = vld [vmem:[#allocation2 + $0x58] sm:$0xff] }
 0x13e   :  { %v125_v44 = vpop.permute.xlu1 %124  ;;  %v210_v31 = vpop.permute.xlu0 %209 }
 0x13f   :  { %405 = vst.msk [vmem:[#allocation2 + $0x10] sm:$0xff] %vm62_vm0, %v388_v43  ;;  %545 = vset.pattern.permute.xlu1 %v624_v2  ;;  %vm165_vm2 = vcmp.eq.s32.totalorder %v125_v44, %v718_v22 }
 0x140   :  { %154 = vperm.xlu1 %545, %v693_v18  }
 0x143   :  { %v189_v45 = vpop.permute.xlu1 %188  ;;  %v149_v35 = vpop.permute.xlu0 %148 }
 0x144   :  { %546 = vset.pattern.permute.xlu1 %v623_v0  ;;  %vm229_vm1 = vcmp.eq.s32.totalorder %v189_v45, %v718_v22 }
 0x145   :  { %218 = vperm.xlu1 %546, %v693_v18   ;;  %vm245_vm3 = vmor %vm165_vm2, %vm229_vm1 }
 0x147   :  { %v152_v39 = vpop.permute.xlu0 %151 }
 0x148   :  { %v269_v47 = vpop.permute.xlu1 %268 }
 0x149   :  { %vm309_vm4 = vcmp.eq.s32.totalorder %v269_v47, %v718_v22  ;;  %547 = vset.pattern.permute.xlu1 %v624_v2  ;;  %v350_v47 = vld [vmem:[#allocation6 + $0x60] sm:$0xff] }
 0x14a   :  { %vm325_vm5 = vmor %vm245_vm3, %vm309_vm4  ;;  %157 = vperm.xlu1 %547, %v698_v19  }
 0x14b   :  { %v373_v49 = vsel %vm325_vm5, %v341_v46, 0.0 }
 0x14c   :  { %v389_v50 = vadd.f32 %v373_v49, %v357_v48  ;;  %v296_v43 = vpop.permute.xlu0 %295  ;;  %v366_v48 = vld [vmem:[#allocation2 + $0x60] sm:$0xff] }
 0x14d   :  { %v128_v51 = vpop.permute.xlu1 %127 }
 0x14e   :  { %406 = vst.msk [vmem:[#allocation2 + $0x18] sm:$0xff] %vm62_vm0, %v389_v50  ;;  %549 = vset.pattern.permute.xlu1 %v626_v6  ;;  %vm166_vm7 = vcmp.eq.s32.totalorder %v128_v51, %v718_v22 }
 0x14f   :  { %301 = vperm.xlu1 %549, %v698_v19   ;;  %v362_v19 = vld [vmem:[#allocation2 + $0x40] sm:$0xff] }
 0x152   :  { %v192_v52 = vpop.permute.xlu1 %191 }
 0x153   :  { %550 = vset.pattern.permute.xlu1 %v624_v2  ;;  %vm230_vm6 = vcmp.eq.s32.totalorder %v192_v52, %v718_v22  ;;  %v299_v52 = vpop.permute.xlu0 %298 }
 0x154   :  { %160 = vperm.xlu1 %550, %v703_v20   ;;  %vm246_vm8 = vmor %vm166_vm7, %vm230_vm6 }
 0x157   :  { %v272_v54 = vpop.permute.xlu1 %271 }
 0x158   :  { %vm310_vm9 = vcmp.eq.s32.totalorder %v272_v54, %v718_v22  ;;  %551 = vset.pattern.permute.xlu1 %v626_v6  ;;  %v351_v54 = vld [vmem:[#allocation6 + $0x68] sm:$0xff] }
 0x159   :  { %vm326_vm10 = vmor %vm246_vm8, %vm310_vm9  ;;  %304 = vperm.xlu1 %551, %v703_v20  }
 0x15a   :  { %v374_v56 = vsel %vm326_vm10, %v342_v53, 0.0 }
 0x15b   :  { %v390_v57 = vadd.f32 %v374_v56, %v358_v55  ;;  %v423_v55 = vld [vmem:[#allocation2 + $0x8] sm:$0xff] }
 0x15c   :  { %v131_v58 = vpop.permute.xlu1 %130  ;;  %v367_v56 = vld [vmem:[#allocation2 + $0x68] sm:$0xff] }
 0x15d   :  { %407 = vst.msk [vmem:[#allocation2 + $0x20] sm:$0xff] %vm62_vm0, %v390_v57  ;;  %vm167_vm12 = vcmp.eq.s32.totalorder %v131_v58, %v718_v22  ;;  %v422_v57 = vld [vmem:[#allocation2] sm:$0xff]  ;;  %v424_v58 = vld [vmem:[#allocation2 + $0x10] sm:$0xff] }
 0x161   :  { %v195_v59 = vpop.permute.xlu1 %194 }
 0x162   :  { %vm231_vm11 = vcmp.eq.s32.totalorder %v195_v59, %v718_v22 }
 0x163   :  { %vm247_vm13 = vmor %vm167_vm12, %vm231_vm11 }
 0x166   :  { %v275_v61 = vpop.permute.xlu1 %274 }
 0x167   :  { %vm311_vm14 = vcmp.eq.s32.totalorder %v275_v61, %v718_v22 }
 0x168   :  { %vm327_vm15 = vmor %vm247_vm13, %vm311_vm14 }
 0x169   :  { %v375_v63 = vsel %vm327_vm15, %v343_v60, 0.0  ;;  %v439_v60 = vsel %vm62_vm0, %v423_v55, 0.0 }
 0x16a   :  { %v391_v0 = vadd.f32 %v375_v63, %v359_v62  ;;  %v222_v63 = vpop.permute.xlu0 %221 }
 0x16b   :  { %v134_v1 = vpop.permute.xlu1 %133 }
 0x16c   :  { %408 = vst.msk [vmem:[#allocation2 + $0x28] sm:$0xff] %vm62_vm0, %v391_v0  ;;  %vm168_vm2 = vcmp.eq.s32.totalorder %v134_v1, %v718_v22  ;;  %v425_v0 = vld [vmem:[#allocation2 + $0x18] sm:$0xff]  ;;  %v438_v1 = vsel %vm62_vm0, %v422_v57, 0.0 }
 0x170   :  { %v198_v2 = vpop.permute.xlu1 %197 }
 0x171   :  { %vm232_vm1 = vcmp.eq.s32.totalorder %v198_v2, %v718_v22  ;;  %v441_v2 = vsel %vm62_vm0, %v424_v58, 0.0 }
 0x172   :  { %vm248_vm3 = vmor %vm168_vm2, %vm232_vm1  ;;  %vm235_vm2 = vcmp.eq.s32.totalorder %v207_v24, %v718_v22 }
 0x175   :  { %v278_v4 = vpop.permute.xlu1 %277 }
 0x176   :  { %vm312_vm4 = vcmp.eq.s32.totalorder %v278_v4, %v718_v22  ;;  %v440_v4 = vadd.f32 %v439_v60, %v438_v1 }
 0x177   :  { %vm328_vm5 = vmor %vm248_vm3, %vm312_vm4 }
 0x178   :  { %v376_v6 = vsel %vm328_vm5, %v344_v3, 0.0  ;;  %v426_v3 = vld [vmem:[#allocation2 + $0x20] sm:$0xff] }
 0x179   :  { %v392_v7 = vadd.f32 %v376_v6, %v360_v5  ;;  %v443_v5 = vsel %vm62_vm0, %v425_v0, 0.0  ;;  %v427_v6 = vld [vmem:[#allocation2 + $0x28] sm:$0xff] }
 0x17a   :  { %v137_v8 = vpop.permute.xlu1 %136 }
 0x17b   :  { %409 = vst.msk [vmem:[#allocation2 + $0x30] sm:$0xff] %vm62_vm0, %v392_v7  ;;  %vm169_vm7 = vcmp.eq.s32.totalorder %v137_v8, %v718_v22  ;;  %v442_v7 = vadd.f32 %v441_v2, %v440_v4  ;;  %v352_v8 = vld [vmem:[#allocation6 + $0x70] sm:$0xff] }
 0x17f   :  { %v201_v9 = vpop.permute.xlu1 %200 }
 0x180   :  { %vm233_vm6 = vcmp.eq.s32.totalorder %v201_v9, %v718_v22 }
 0x181   :  { %vm249_vm8 = vmor %vm169_vm7, %vm233_vm6  ;;  %vm236_vm7 = vcmp.eq.s32.totalorder %v210_v31, %v718_v22  ;;  %v353_v31 = vld [vmem:[#allocation6 + $0x78] sm:$0xff] }
 0x184   :  { %v281_v11 = vpop.permute.xlu1 %280 }
 0x185   :  { %vm313_vm9 = vcmp.eq.s32.totalorder %v281_v11, %v718_v22  ;;  %v368_v11 = vld [vmem:[#allocation2 + $0x70] sm:$0xff] }
 0x186   :  { %vm329_vm10 = vmor %vm249_vm8, %vm313_vm9 }
 0x187   :  { %v377_v13 = vsel %vm329_vm10, %v345_v10, 0.0  ;;  %v445_v10 = vsel %vm62_vm0, %v426_v3, 0.0 }
 0x188   :  { %v393_v14 = vadd.f32 %v377_v13, %v361_v12  ;;  %v428_v12 = vld [vmem:[#allocation2 + $0x30] sm:$0xff]  ;;  %v444_v13 = vadd.f32 %v443_v5, %v442_v7 }
 0x189   :  { %v140_v15 = vpop.permute.xlu1 %139 }
 0x18a   :  { %410 = vst.msk [vmem:[#allocation2 + $0x38] sm:$0xff] %vm62_vm0, %v393_v14  ;;  %vm170_vm12 = vcmp.eq.s32.totalorder %v140_v15, %v718_v22  ;;  %v447_v14 = vsel %vm62_vm0, %v427_v6, 0.0 }
 0x18e   :  { %v204_v16 = vpop.permute.xlu1 %203 }
 0x18f   :  { %vm234_vm11 = vcmp.eq.s32.totalorder %v204_v16, %v718_v22 }
 0x190   :  { %vm250_vm13 = vmor %vm170_vm12, %vm234_vm11  ;;  %vm173_vm12 = vcmp.eq.s32.totalorder %v149_v35, %v718_v22 }
 0x191   :  { %v429_v16 = vld [vmem:[#allocation2 + $0x38] sm:$0xff] }
 0x193   :  { %v284_v18 = vpop.permute.xlu1 %283 }
 0x194   :  { %vm314_vm14 = vcmp.eq.s32.totalorder %v284_v18, %v718_v22 }
 0x195   :  { %vm330_vm15 = vmor %vm250_vm13, %vm314_vm14 }
 0x196   :  { %v378_v20 = vsel %vm330_vm15, %v346_v17, 0.0  ;;  %v446_v17 = vadd.f32 %v445_v10, %v444_v13 }
 0x197   :  { %v394_v21 = vadd.f32 %v378_v20, %v362_v19  ;;  %v449_v19 = vsel %vm62_vm0, %v428_v12, 0.0 }
 0x198   :  { %v143_v23 = vpop.permute.xlu1 %142  ;;  %v448_v24 = vadd.f32 %v447_v14, %v446_v17 }
 0x199   :  { %411 = vst.msk [vmem:[#allocation2 + $0x40] sm:$0xff] %vm62_vm0, %v394_v21  ;;  %vm171_vm1 = vcmp.eq.s32.totalorder %v143_v23, %v718_v22  ;;  %v225_v21 = vpop.permute.xlu0 %224 }
 0x19a   :  { %vm251_vm3 = vmor %vm171_vm1, %vm235_vm2  ;;  %vm174_vm1 = vcmp.eq.s32.totalorder %v152_v39, %v718_v22  ;;  %vm318_vm2 = vcmp.eq.s32.totalorder %v296_v43, %v718_v22 }
 0x19d   :  { %v287_v26 = vpop.permute.xlu1 %286 }
 0x19e   :  { %vm315_vm4 = vcmp.eq.s32.totalorder %v287_v26, %v718_v22 }
 0x19f   :  { %vm331_vm5 = vmor %vm251_vm3, %vm315_vm4 }
 0x1a0   :  { %v379_v28 = vsel %vm331_vm5, %v347_v25, 0.0  ;;  %v430_v23 = vld [vmem:[#allocation2 + $0x40] sm:$0xff]  ;;  %v451_v25 = vsel %vm62_vm0, %v429_v16, 0.0 }
 0x1a1   :  { %v395_v29 = vadd.f32 %v379_v28, %v363_v27  ;;  %v450_v27 = vadd.f32 %v449_v19, %v448_v24  ;;  %v453_v28 = vsel %vm62_vm0, %v430_v23, 0.0 }
 0x1a2   :  { %v146_v30 = vpop.permute.xlu1 %145 }
 0x1a3   :  { %412 = vst.msk [vmem:[#allocation2 + $0x48] sm:$0xff] %vm62_vm0, %v395_v29  ;;  %vm172_vm6 = vcmp.eq.s32.totalorder %v146_v30, %v718_v22  ;;  %v452_v30 = vadd.f32 %v451_v25, %v450_v27 }
 0x1a4   :  { %vm252_vm8 = vmor %vm172_vm6, %vm236_vm7 }
 0x1a7   :  { %v290_v33 = vpop.permute.xlu1 %289 }
 0x1a8   :  { %vm316_vm9 = vcmp.eq.s32.totalorder %v290_v33, %v718_v22 }
 0x1a9   :  { %vm332_vm10 = vmor %vm252_vm8, %vm316_vm9  ;;  %vm319_vm8 = vcmp.eq.s32.totalorder %v299_v52, %v718_v22 }
 0x1aa   :  { %v380_v36 = vsel %vm332_vm10, %v348_v32, 0.0  ;;  %v431_v26 = vld [vmem:[#allocation2 + $0x48] sm:$0xff] }
 0x1ab   :  { %v396_v37 = vadd.f32 %v380_v36, %v364_v34  ;;  %v455_v33 = vsel %vm62_vm0, %v431_v26, 0.0  ;;  %v369_v34 = vld [vmem:[#allocation2 + $0x78] sm:$0xff]  ;;  %v454_v36 = vadd.f32 %v453_v28, %v452_v30 }
 0x1ac   :  { %v213_v38 = vpop.permute.xlu1 %212 }
 0x1ad   :  { %413 = vst.msk [vmem:[#allocation2 + $0x50] sm:$0xff] %vm62_vm0, %v396_v37  ;;  %vm237_vm11 = vcmp.eq.s32.totalorder %v213_v38, %v718_v22 }
 0x1ae   :  { %vm253_vm13 = vmor %vm173_vm12, %vm237_vm11  ;;  %vm240_vm12 = vcmp.eq.s32.totalorder %v222_v63, %v718_v22 }
 0x1b1   :  { %v293_v41 = vpop.permute.xlu1 %292 }
 0x1b2   :  { %vm317_vm14 = vcmp.eq.s32.totalorder %v293_v41, %v718_v22 }
 0x1b3   :  { %vm333_vm15 = vmor %vm253_vm13, %vm317_vm14 }
 0x1b4   :  { %v381_v44 = vsel %vm333_vm15, %v349_v40, 0.0  ;;  %v432_v29 = vld [vmem:[#allocation2 + $0x50] sm:$0xff]  ;;  %v456_v40 = vadd.f32 %v455_v33, %v454_v36 }
 0x1b5   :  { %v397_v45 = vadd.f32 %v381_v44, %v365_v42  ;;  %v457_v37 = vsel %vm62_vm0, %v432_v29, 0.0 }
 0x1b6   :  { %v216_v46 = vpop.permute.xlu1 %215  ;;  %v458_v44 = vadd.f32 %v457_v37, %v456_v40 }
 0x1b7   :  { %414 = vst.msk [vmem:[#allocation2 + $0x58] sm:$0xff] %vm62_vm0, %v397_v45  ;;  %vm238_vm3 = vcmp.eq.s32.totalorder %v216_v46, %v718_v22 }
 0x1b8   :  { %vm254_vm4 = vmor %vm174_vm1, %vm238_vm3 }
 0x1b9   :  { %vm334_vm5 = vmor %vm254_vm4, %vm318_vm2  ;;  %vm241_vm2 = vcmp.eq.s32.totalorder %v225_v21, %v718_v22 }
 0x1ba   :  { %v382_v49 = vsel %vm334_vm5, %v350_v47, 0.0 }
 0x1bb   :  { %v398_v50 = vadd.f32 %v382_v49, %v366_v48  ;;  %v155_v51 = vpop.permute.xlu1 %154 }
 0x1bc   :  { %vm175_vm6 = vcmp.eq.s32.totalorder %v155_v51, %v718_v22 }
 0x1bd   :  { %415 = vst.msk [vmem:[#allocation2 + $0x60] sm:$0xff] %vm62_vm0, %v398_v50 }
 0x1be   :  { %v433_v35 = vld [vmem:[#allocation2 + $0x58] sm:$0xff] }
 0x1bf   :  { %v459_v42 = vsel %vm62_vm0, %v433_v35, 0.0 }
 0x1c0   :  { %v219_v53 = vpop.permute.xlu1 %218 }
 0x1c1   :  { %vm239_vm7 = vcmp.eq.s32.totalorder %v219_v53, %v718_v22 }
 0x1c2   :  { %vm255_vm9 = vmor %vm175_vm6, %vm239_vm7  ;;  %vm479_vm6 = vcmask 0  }
 0x1c3   :  { %vm335_vm10 = vmor %vm255_vm9, %vm319_vm8 }
 0x1c4   :  { %v383_v59 = vsel %vm335_vm10, %v351_v54, 0.0  ;;  %v434_v39 = vld [vmem:[#allocation2 + $0x60] sm:$0xff] }
 0x1c5   :  { %v399_v61 = vadd.f32 %v383_v59, %v367_v56  ;;  %v158_v62 = vpop.permute.xlu1 %157  ;;  %v461_v45 = vsel %vm62_vm0, %v434_v39, 0.0 }
 0x1c6   :  { %vm176_vm11 = vcmp.eq.s32.totalorder %v158_v62, %v718_v22 }
 0x1c7   :  { %416 = vst.msk [vmem:[#allocation2 + $0x68] sm:$0xff] %vm62_vm0, %v399_v61  ;;  %vm256_vm13 = vmor %vm176_vm11, %vm240_vm12 }
 0x1ca   :  { %v302_v9 = vpop.permute.xlu1 %301 }
 0x1cb   :  { %vm320_vm14 = vcmp.eq.s32.totalorder %v302_v9, %v718_v22 }
 0x1cc   :  { %vm336_vm15 = vmor %vm256_vm13, %vm320_vm14 }
 0x1cd   :  { %v384_v15 = vsel %vm336_vm15, %v352_v8, 0.0 }
 0x1ce   :  { %v400_v18 = vadd.f32 %v384_v15, %v368_v11  ;;  %v435_v43 = vld [vmem:[#allocation2 + $0x68] sm:$0xff] }
 0x1cf   :  { %v161_v20 = vpop.permute.xlu1 %160  ;;  %v463_v47 = vsel %vm62_vm0, %v435_v43, 0.0 }
 0x1d0   :  { %417 = vst.msk [vmem:[#allocation2 + $0x70] sm:$0xff] %vm62_vm0, %v400_v18  ;;  %vm177_vm1 = vcmp.eq.s32.totalorder %v161_v20, %v718_v22 }
 0x1d1   :  { %vm257_vm3 = vmor %vm177_vm1, %vm241_vm2 }
 0x1d4   :  { %v305_v32 = vpop.permute.xlu1 %304 }
 0x1d5   :  { %vm321_vm4 = vcmp.eq.s32.totalorder %v305_v32, %v718_v22  ;;  %v460_v22 = vadd.f32 %v459_v42, %v458_v44 }
 0x1d6   :  { %vm337_vm5 = vmor %vm257_vm3, %vm321_vm4 }
 0x1d7   :  { %v385_v38 = vsel %vm337_vm5, %v353_v31, 0.0  ;;  %v436_v46 = vld [vmem:[#allocation2 + $0x70] sm:$0xff]  ;;  %v462_v48 = vadd.f32 %v461_v45, %v460_v22 }
 0x1d8   :  { %v401_v41 = vadd.f32 %v385_v38, %v369_v34  ;;  %v465_v49 = vsel %vm62_vm0, %v436_v46, 0.0 }
 0x1d9   :  { %v464_v50 = vadd.f32 %v463_v47, %v462_v48 }
 0x1da   :  { %418 = vst.msk [vmem:[#allocation2 + $0x78] sm:$0xff] %vm62_vm0, %v401_v41 }
 0x1db   :  { %v466_v52 = vadd.f32 %v465_v49, %v464_v50 }
 0x1e1   :  { %v437_v51 = vld [vmem:[#allocation2 + $0x78] sm:$0xff] }
 0x1e2   :  { %v467_v53 = vsel %vm62_vm0, %v437_v51, 0.0 }
 0x1e3   :  { %v468_v54 = vadd.f32 %v467_v53, %v466_v52 }
 0x1e5   :  { %v469_v55 = vrot.slane %v468_v54, 4 }
 0x1e7   :  { %v470_v56 = vadd.f32 %v469_v55, %v468_v54 }
 0x1e9   :  { %v471_v57 = vrot.slane %v470_v56, 2 }
 0x1eb   :  { %v472_v58 = vadd.f32 %v471_v57, %v470_v56 }
 0x1ed   :  { %v473_v59 = vrot.slane %v472_v58, 1 }
 0x1ef   :  { %v474_v60 = vadd.f32 %v473_v59, %v472_v58 }
 0x1f1   :  { %v475_v61 = vsel %vm62_vm0, %v474_v60, 0.0 }
 0x1f2   :  { %476 = vadd.xlane.f32.xlu0 %v475_v61 }
 0x27b   :  { %v477_v62 = vpop.xlane.xlu0 %476 }
 0x27c   :  { %v478_v63 = vmul.f32 -0.041666668, %v477_v62 }
 0x27e   :  { %480 = vst.msk [vmem:[#allocation8] sm:$0x1] %vm479_vm6, %v478_v63 }
 0x27f   :  { %604 = shalt.err (!%p601_p0)
}
 0x280   :  { %490 = dma.vmem_to_hbm [thread:$0]  %s488_s1, 16, %s833_s2, [#allocation5]  }
 0x281   :  { %617 = dma.done.wait [#allocation5], 16  }
 0x282   :  { %618 = vsyncadd [#allocation5], 4294967280 }
 0x283   :  { %494 = vsyncpa [#allocation4], 1 }
 0x284   :  { %495 = vsyncpa [#allocation7], 1 }
 0x285   :  { %496 = vsyncpa [#allocation5], 1 }

</bundles_post_ra>
